<compile_context>
chip_gen: v5e
topology: v5e:2x2
jax: 0.10.0
libtpu: 0.0.40
codegen_flags: <defaults>
</compile_context>

<pallas_src>
import functools

import jax
import jax.numpy as jnp
import numpy as np
from jax.experimental import pallas as pl
from jax.experimental.pallas import tpu as pltpu


# ----------------------------------------------------------------------------
# Pallas kernel: one MXU matmul + fused ReLU over a block of BT slices.
#   x_ref : (tb, P*C)   flattened per-slice features (bf16)
#   k_ref : (P*C, P*O)  eig-folded effective weight   (bf16)
#   o_ref : (tb, P*O)   relu(x @ K), lane-dense output (bf16)
# ----------------------------------------------------------------------------
def spectral_kernel(x_ref, k_ref, o_ref):
    y = jnp.dot(x_ref[...], k_ref[...], preferred_element_type=jnp.float32)
    o_ref[...] = jnp.maximum(y, 0.0).astype(o_ref.dtype)


def _round_up(x, m):
    return ((x + m - 1) // m) * m


def spectral_pallas(x, kmat, *, tb=None, out_dtype=jnp.bfloat16):
    """x: (BT, P*C), kmat: (P*C, P*O) -> (BT, P*O) = relu(x @ kmat)."""
    BT, CP = x.shape
    CP2, OP = kmat.shape
    assert CP == CP2

    if tb is None:
        # Largest block <= 1024 rows that still gives >= 2 grid blocks when
        # possible (so 'parallel' shards across v7x's 2 TensorCores).  bf16
        # footprint at tb=1024: 2*(tb*CP + tb*OP)*2B + CP*OP*2B << scoped VMEM
        # on all of v5e / v6e / v7x, so no vmem_limit_bytes override is needed.
        tb = min(1024, max(8, _round_up(pl.cdiv(BT, 2), 8)))

    num_blocks = pl.cdiv(BT, tb)          # ragged last block handled by Pallas
    semantics = ("parallel",) if num_blocks > 1 else ("arbitrary",)

    itemsize_in = jnp.dtype(x.dtype).itemsize
    itemsize_w = jnp.dtype(kmat.dtype).itemsize
    itemsize_out = jnp.dtype(out_dtype).itemsize
    cost = pl.CostEstimate(
        flops=2 * BT * CP * OP,
        transcendentals=0,
        bytes_accessed=BT * CP * itemsize_in + CP * OP * itemsize_w
        + BT * OP * itemsize_out,
    )

    # TODO(synk): the constant-weight operand could use pipeline_mode=pl.Buffered(1)
    # (single buffer) as a minor VMEM hygiene win; skipped to keep lowering simple.
    return pl.pallas_call(
        spectral_kernel,
        out_shape=jax.ShapeDtypeStruct((BT, OP), out_dtype),
        grid=(num_blocks,),
        in_specs=[
            pl.BlockSpec((tb, CP), lambda i: (i, 0)),
            pl.BlockSpec((CP, OP), lambda i: (0, 0)),   # constant weight operand
        ],
        out_specs=pl.BlockSpec((tb, OP), lambda i: (i, 0)),
        compiler_params=pltpu.CompilerParams(dimension_semantics=semantics),
        cost_estimate=cost,
    )(x, kmat)


# ----------------------------------------------------------------------------
# Glue (plain JAX): get_square_feats + eig folding + flatten
# ----------------------------------------------------------------------------
def get_square_feats_jax(feats, times, n_times, pts_per_time):
    """JAX version of get_square_feats.

    The torch version groups points by each unique time (iterated in sorted
    order) with original intra-group order preserved.  A stable argsort by
    time reproduces that exactly *provided every unique time appears exactly
    pts_per_time times* (validated host-side in __main__).
    """
    # TODO(synk): data-dependent torch.unique(dim=1)/boolean-mask gather has no
    # static-shape Pallas equivalent; handled here in glue with static T, P.
    B, N, C = feats.shape
    order = jnp.argsort(times, axis=1, stable=True)
    sorted_feats = jnp.take_along_axis(feats, order[..., None], axis=1)
    return sorted_feats.reshape(B, n_times, pts_per_time, C)


@functools.partial(jax.jit, static_argnames=("n_times", "pts_per_time"))
def spectral_forward(feats, pos, times, ids, eig, param, *, n_times, pts_per_time):
    """Full forward: returns (B, n_times * pts_per_time, out_size) in bf16."""
    del pos, ids  # unused by the original compute path (ids only feed an assert)
    B, _, C = feats.shape
    O, _, eig_dims = param.shape
    T, P = n_times, pts_per_time

    # bf16 activations before the gather so the reorder itself moves half the
    # bytes; the kernel dot accumulates in f32 (the f32 path at DEFAULT MXU
    # precision already runs bf16 passes, so this costs no extra accuracy).
    square_feats = get_square_feats_jax(
        feats.astype(jnp.bfloat16), times, T, P)                     # (B,T,P,C)

    # zero-pad eig rows to eig_dims, matching transform()
    if eig.shape[0] != eig_dims:
        zs = jnp.zeros((eig_dims - eig.shape[0], eig.shape[1]), eig.dtype)
        eig = jnp.concatenate([eig, zs], axis=0)                     # (E, P)

    # Fold eig into the weights once, outside the kernel, with row index (q,c)
    # so the activation needs NO transpose (free row-major reshape only):
    #   K[(q,c),(p,o)] = sum_e param[o,c,e] * eig[e,q] * eig[e,p]
    kmat = jnp.einsum("oce,eq,ep->qcpo", param, eig, eig).reshape(P * C, P * O)
    kmat = kmat.astype(jnp.bfloat16)

    f = square_feats.reshape(B * T, P * C)                           # free reshape

    y = spectral_pallas(f, kmat)                                     # (BT, P*O) bf16
    # (BT, P*O) row-major == (B, T*P, O) row-major -> plain reshape (flatten()).
    return y.reshape(B, T * P, O)


# ----------------------------------------------------------------------------
# Pure-JAX f32 reference (mirrors the PyTorch math exactly) for verification
# ----------------------------------------------------------------------------
def spectral_reference(feats, times, eig, param, *, n_times, pts_per_time):
    B = feats.shape[0]
    eig_dims = param.shape[-1]
    sq = get_square_feats_jax(feats, times, n_times, pts_per_time)
    if eig.shape[0] != eig_dims:
        zs = jnp.zeros((eig_dims - eig.shape[0], eig.shape[1]), eig.dtype)
        eig = jnp.concatenate([eig, zs], axis=0)
    f = jnp.transpose(sq, (0, 1, 3, 2))                      # (B, T, C, P)
    x1 = jnp.matmul(f, eig.T)                                # (B, T, C, E)
    x2 = x1[:, :, None, :, :] * param[None, None]            # (B, T, O, C, E)
    x3 = x2.sum(axis=3)                                      # (B, T, O, E)
    x4 = jnp.matmul(x3, eig)                                 # (B, T, O, P)
    out = jnp.maximum(jnp.transpose(x4, (0, 1, 3, 2)), 0.0)  # (B, T, P, O)
    return out.reshape(B, n_times * pts_per_time, -1)


def _check_times(times_np, n_times, pts_per_time):
    """Host-side guard matching the torch assert + square-reshape assumption."""
    assert np.all(times_np == times_np[0:1]), "times must match across batch"
    vals, counts = np.unique(times_np[0], return_counts=True)
    assert vals.size == n_times and np.all(counts == pts_per_time), (vals, counts)


# ----------------------------------------------------------------------------
# main
# ----------------------------------------------------------------------------
if __name__ == "__main__":
    key = jax.random.PRNGKey(0)

    # module hyper-params
    in_size, pos_size, out_size, eig_dims = 5, 3, 8, 8
    C = in_size + pos_size

    # data shapes
    B = 2            # batch
    T = 4            # unique times
    P = 16           # points per time
    N = T * P        # total points
    E_given = 6      # eig rows provided (< eig_dims -> exercises zero-pad path)

    k1, k2, k3, k4 = jax.random.split(key, 4)
    feats = jax.random.normal(k1, (B, N, C), dtype=jnp.float32)
    pos = jax.random.normal(k2, (B, N, pos_size), dtype=jnp.float32)
    # times: each unique time repeated P times, same across batch (per torch assert)
    times = jnp.tile(jnp.repeat(jnp.arange(T, dtype=jnp.int32), P)[None, :], (B, 1))
    ids = jnp.tile(jnp.arange(N, dtype=jnp.int32)[None, :], (B, 1))
    eig = jax.random.normal(k3, (E_given, P), dtype=jnp.float32)

    # deterministic kaiming_uniform_(nonlinearity='relu') init for param
    fan_in = C * eig_dims
    bound = float(np.sqrt(2.0) * np.sqrt(3.0 / fan_in))      # gain*sqrt(3/fan_in)
    param = jax.random.uniform(k4, (out_size, C, eig_dims), dtype=jnp.float32,
                               minval=-bound, maxval=bound)

    _check_times(np.asarray(times), T, P)

    out = spectral_forward(feats, pos, times, ids, eig, param,
                           n_times=T, pts_per_time=P)
    out = jax.block_until_ready(out)

    ref = np.asarray(jax.block_until_ready(
        spectral_reference(feats, times, eig, param, n_times=T, pts_per_time=P)))

    assert out.shape == (B, N, out_size), out.shape
    out_f32 = np.asarray(out).astype(np.float32)

    # bf16 operands/output + eig-folded summation order => bf16-level tolerances.
    rel = np.linalg.norm(out_f32 - ref) / (np.linalg.norm(ref) + 1e-12)
    assert rel < 1e-2, f"relative Frobenius error too large: {rel}"
    np.testing.assert_allclose(out_f32, ref, rtol=5e-2, atol=0.2)
    print("KERNEL_OK")
</pallas_src>

<mosaic_0001>
module attributes {stable_mosaic.version = 11 : i64} {
  func.func @spectral_kernel(%arg0: i32, %arg1: memref<8x128xbf16, #tpu.memory_space<vmem>>, %arg2: memref<128x128xbf16, #tpu.memory_space<vmem>>, %arg3: memref<8x128xbf16, #tpu.memory_space<vmem>>) attributes {dimension_semantics = [#tpu.dimension_semantics<arbitrary>], iteration_bounds = array<i64: 1>, scalar_prefetch = 0 : i64, scratch_operands = 0 : i64, tpu.core_type = #tpu.core_type<tc>, window_params = [{transform_indices = @transform_0, window_bounds = array<i64: 8, 128>}, {pipeline_mode = #tpu.pipeline_mode<synchronous>, transform_indices = @transform_1, window_bounds = array<i64: 128, 128>}, {transform_indices = @transform_2, window_bounds = array<i64: 8, 128>}]} {
    %c0 = arith.constant 0 : index
    %c0_0 = arith.constant 0 : index
    %0 = vector.load %arg1[%c0, %c0_0] : memref<8x128xbf16, #tpu.memory_space<vmem>>, vector<8x128xbf16>
    %c0_1 = arith.constant 0 : index
    %c0_2 = arith.constant 0 : index
    %1 = vector.load %arg2[%c0_1, %c0_2] : memref<128x128xbf16, #tpu.memory_space<vmem>>, vector<128x128xbf16>
    %cst = arith.constant dense<0.000000e+00> : vector<8x128xf32>
    %2 = tpu.matmul %0, %1, %cst {dimension_numbers = #tpu.dot_dimension_numbers<[1], [0], [0], [1], [0, 0, 1, 1], [], []>} : vector<8x128xbf16>, vector<128x128xbf16>, vector<8x128xf32> -> vector<8x128xf32>
    %cst_3 = arith.constant 0.000000e+00 : f32
    %3 = vector.broadcast %cst_3 : f32 to vector<8x128xf32>
    %4 = arith.maximumf %2, %3 : vector<8x128xf32>
    %5 = arith.truncf %4 : vector<8x128xf32> to vector<8x128xbf16>
    %c0_4 = arith.constant 0 : index
    %c0_5 = arith.constant 0 : index
    %6 = vector.load %arg3[%c0_4, %c0_5] : memref<8x128xbf16, #tpu.memory_space<vmem>>, vector<8x128xbf16>
    tpu.vector_store %arg3[%c0_4, %c0_5], %5 {strides = array<i32>} : memref<8x128xbf16, #tpu.memory_space<vmem>>, vector<8x128xbf16>,
    return
  }
  func.func @transform_0(%arg0: i32) -> (i32, i32) {
    %c0_i32 = arith.constant 0 : i32
    %c0_i32_0 = arith.constant 0 : i32
    return %arg0, %c0_i32 : i32, i32
  }
  func.func @transform_1(%arg0: i32) -> (i32, i32) {
    %c0_i32 = arith.constant 0 : i32
    %c0_i32_0 = arith.constant 0 : i32
    %c0_i32_1 = arith.constant 0 : i32
    return %c0_i32, %c0_i32_0 : i32, i32
  }
  func.func @transform_2(%arg0: i32) -> (i32, i32) {
    %c0_i32 = arith.constant 0 : i32
    %c0_i32_0 = arith.constant 0 : i32
    return %arg0, %c0_i32 : i32, i32
  }
}

</mosaic_0001>

<bundles_post_ra>
// kernel: spectral_forward.1
= control target key start
LH: loop header
LB: loop body
LE: loop exit
PB: predicated region body
PF: predicated region fallthrough
CT: control target
= control target key end

     0   :  { %s181_s1 = inlined_call_operand.vmem [shape: bf16[128,128], index: 1, kind: input, shape index: {}]   ;;  %s182_s0 = inlined_call_operand.vmem [shape: bf16[8,128], index: 0, kind: input, shape index: {}]   ;;  %s183_s2 = inlined_call_operand.vmem [shape: bf16[8,128], index: 2, kind: output, shape index: {}]  }
   0x1   :  { %v135_v0 = vld [vmem:[%s181_s1 + $0x38] sm:$0xff]  ;;  %v134_v1 = vld [vmem:[%s181_s1 + $0x30] sm:$0xff]  ;;  %v133_v2 = vld [vmem:[%s181_s1 + $0x28] sm:$0xff] }
   0x2   :  { %76 = vmatpush.bf16.msra.mxu0 %v135_v0  ;;  %v132_v3 = vld [vmem:[%s181_s1 + $0x20] sm:$0xff]  ;;  %v131_v4 = vld [vmem:[%s181_s1 + $0x18] sm:$0xff]  ;;  %v130_v5 = vld [vmem:[%s181_s1 + $0x10] sm:$0xff] }
   0x3   :  { %v129_v6 = vld [vmem:[%s181_s1 + $0x8] sm:$0xff]  ;;  %v128_v7 = vld [vmem:[%s181_s1] sm:$0xff] }
   0x4   :  { %v11_v8 = vld [vmem:[%s182_s0] sm:$0xf] }
   0x6   :  { %77 = vmatpush.bf16.msra.mxu0 %v134_v1 }
   0xa   :  { %78 = vmatpush.bf16.msra.mxu0 %v133_v2 }
   0xe   :  { %79 = vmatpush.bf16.msra.mxu0 %v132_v3 }
  0x12   :  { %80 = vmatpush.bf16.msra.mxu0 %v131_v4 }
  0x16   :  { %81 = vmatpush.bf16.msra.mxu0 %v130_v5 }
  0x1a   :  { %82 = vmatpush.bf16.msra.mxu0 %v129_v6 }
  0x1e   :  { %83 = vmatpush.bf16.msra.mxu0 %v128_v7 }
  0x21   :  { %84 = vmatmul.bf16.vlgmr.msra.gmra.mxu0 %v11_v8 }
  0x9e   :  { %v85_v9 = vpop.f32.mrf.mxu0 }
  0x9f   :  { %v89_v10 = vmax.f32 %v85_v9, 0.0 }
  0xa1   :  { %v90_v11 = vpack.c.bf16 %v89_v10, %v89_v10 }
  0xa3   :  { %91 = vst [vmem:[%s183_s2] sm:$0xf] %v90_v11 }
  0xa6   :  { %v87_v12 = vpop.f32.mrf.mxu0 }

</bundles_post_ra>
